<compile_context>
chip_gen: v5e
topology: v5e:2x2
jax: 0.10.0
libtpu: 0.0.40
codegen_flags: <defaults>
</compile_context>

<pallas_src>
import functools
import math

import jax
import jax.numpy as jnp
from jax.experimental import pallas as pl
from jax.experimental.pallas import tpu as pltpu

_LANES = 128


def _lpa_gcn_kernel(xy_ref, a_ref, w_ref, b_ref, mask_ref,
                    xout_ref, yout_ref, *, len_walk, mxu_dtype):
    f32 = jnp.float32

    # 1) An = row-L1-normalize(A * A_mask).
    #    Exact reciprocal: it is only N values, and approx error would
    #    compound through An^len_walk.
    a = a_ref[...] * mask_ref[...]
    row_l1 = jnp.sum(jnp.abs(a), axis=1, keepdims=True)
    inv = pl.reciprocal(jnp.maximum(row_l1, 1e-12), approx=False)
    an = (a * inv).astype(mxu_dtype)

    # 2) Lane-dense fused RHS = [X@W | y | 0...] in a single MXU pass:
    #    Xy = [X | y], Wz = blockdiag(W, I_C) padded to 128 lanes (wrapper).
    rhs = jnp.dot(xy_ref[...].astype(mxu_dtype), w_ref[...].astype(mxu_dtype),
                  preferred_element_type=f32)                      # [N, 128]

    # 3) One An pass feeds both outputs:
    #    cols [:O] = An@XW, cols [O:O+C] = An@y, rest zero.
    fused = jnp.dot(an, rhs.astype(mxu_dtype),
                    preferred_element_type=f32)                    # [N, 128]

    # 4) X_out slab (bias is already padded to 128 lanes, zero past O).
    #    Full-width unmasked store; wrapper slices cols [:O].
    xout_ref[...] = fused + b_ref[...]

    # 5) y_hat = An^len_walk @ y, applied iteratively. The walk runs on the
    #    full 128-lane slab: MXU time per pass is one lane tile regardless of
    #    RHS width, and this keeps the final store lane-dense (no concat).
    #    Wrapper slices cols [O:O+C].
    if len_walk <= 0:
        yout_ref[...] = rhs                       # An^0 = I  ->  y itself
    else:
        v = fused                                 # first An application done
        for _ in range(len_walk - 1):
            v = jnp.dot(an, v.astype(mxu_dtype), preferred_element_type=f32)
        yout_ref[...] = v


@functools.partial(jax.jit, static_argnames=("len_walk", "mxu_dtype"))
def lpa_gcn_layer_forward(X, A, y, weight, bias, A_mask, *, len_walk,
                          mxu_dtype=jnp.bfloat16):
    """Pallas implementation of LPA_GCN_layer.forward. Returns (X_out, y_hat)."""
    f32 = jnp.float32
    N, Fin = X.shape
    O = weight.shape[1]
    C = y.shape[1]
    assert O + C <= _LANES, "fused output exceeds one lane tile"

    # Wrapper-side layout plumbing (fused under jit with the pallas_call):
    #   [X | y] @ [[W, 0, 0], [0, I_C, 0]]  ==  [X@W | y | 0...]   (128 lanes)
    Xy = jnp.concatenate([X.astype(f32), y.astype(f32)], axis=1)   # [N, Fin+C]
    Wz = jnp.zeros((Fin + C, _LANES), dtype=f32)
    Wz = Wz.at[:Fin, :O].set(weight.astype(f32))
    Wz = Wz.at[Fin:, O:O + C].set(jnp.eye(C, dtype=f32))
    bpad = jnp.zeros((1, _LANES), dtype=f32)
    if bias is not None:
        bpad = bpad.at[0, :O].set(bias.astype(f32))

    kernel = functools.partial(_lpa_gcn_kernel,
                               len_walk=int(len_walk), mxu_dtype=mxu_dtype)
    vmem = pl.BlockSpec(memory_space=pltpu.MemorySpace.VMEM)

    # Advisory cost + explicit VMEM budget (capped at 64 MiB for v7x; raised
    # above v5e's 16 MiB scoped default).
    n_passes = max(int(len_walk), 1)
    flops = int(2 * N * (Fin + C) * _LANES + 2 * n_passes * N * N * _LANES
                + 3 * N * N)
    bytes_accessed = int(4 * (N * (Fin + C) + 2 * N * N
                              + (Fin + C + 1) * _LANES + 2 * N * _LANES))
    vmem_est = int(4 * (4 * N * N + 6 * N * _LANES
                        + N * (Fin + C) + (Fin + C + 1) * _LANES))
    vmem_limit = int(min(64 * 1024 * 1024, max(32 * 1024 * 1024, 4 * vmem_est)))

    out_x, out_y = pl.pallas_call(
        kernel,
        out_shape=(jax.ShapeDtypeStruct((N, _LANES), f32),
                   jax.ShapeDtypeStruct((N, _LANES), f32)),
        in_specs=[vmem] * 5,
        out_specs=(vmem, vmem),
        compiler_params=pltpu.CompilerParams(vmem_limit_bytes=vmem_limit),
        cost_estimate=pl.CostEstimate(flops=flops, transcendentals=0,
                                      bytes_accessed=bytes_accessed),
    )(Xy, A, Wz, bpad, A_mask)

    # Free slices (fused under jit); cols past O / O+C are scratch lanes.
    return out_x[:, :O], out_y[:, O:O + C]


def _reference(X, A, y, weight, bias, A_mask, len_walk):
    """Pure-JAX reference mirroring the PyTorch forward, for verification."""
    XW = X @ weight
    An = A * A_mask
    row = jnp.sum(jnp.abs(An), axis=1, keepdims=True)
    An = An / jnp.maximum(row, 1e-12)
    Xo = An @ XW
    if bias is not None:
        Xo = Xo + bias
    Ap = jnp.linalg.matrix_power(An, len_walk)
    return Xo, Ap @ y


if __name__ == "__main__":
    # Small, module-consistent shapes.
    N, Fin, O, C = 16, 8, 32, 4
    len_walk = 3

    key = jax.random.PRNGKey(0)
    k_x, k_a, k_y, k_w, k_b = jax.random.split(key, 5)

    X = jax.random.normal(k_x, (N, Fin), dtype=jnp.float32)
    A = jax.random.uniform(k_a, (N, N), dtype=jnp.float32)   # dense non-neg adjacency
    y = jax.random.uniform(k_y, (N, C), dtype=jnp.float32)

    # Deterministic parameter init, matching reset_parameters():
    stdv = 1.0 / math.sqrt(O)
    weight = jax.random.uniform(k_w, (Fin, O), dtype=jnp.float32,
                                minval=-stdv, maxval=stdv)
    bias = jax.random.uniform(k_b, (O,), dtype=jnp.float32,
                              minval=-stdv, maxval=stdv)
    A_mask = A.copy()   # Parameter(A.clone())

    X_ref, yhat_ref = _reference(X, A, y, weight, bias, A_mask, len_walk)

    # f32 MXU-operand path: exact normalization, should match tightly.
    Xo32, yh32 = lpa_gcn_layer_forward(X, A, y, weight, bias, A_mask,
                                       len_walk=len_walk, mxu_dtype=jnp.float32)
    jax.block_until_ready((Xo32, yh32))
    assert jnp.allclose(Xo32, X_ref, atol=1e-3, rtol=1e-3)
    assert jnp.allclose(yh32, yhat_ref, atol=1e-3, rtol=1e-3)

    # bf16 MXU-operand path (fast path): f32 accumulation, looser tolerance.
    Xo16, yh16 = lpa_gcn_layer_forward(X, A, y, weight, bias, A_mask,
                                       len_walk=len_walk)
    jax.block_until_ready((Xo16, yh16))
    assert jnp.allclose(Xo16, X_ref, atol=5e-2, rtol=5e-2)
    assert jnp.allclose(yh16, yhat_ref, atol=5e-2, rtol=5e-2)

    print("KERNEL_OK")
</pallas_src>

<mosaic_0001>
module attributes {stable_mosaic.version = 11 : i64} {
  func.func @_lpa_gcn_kernel(%arg0: memref<16x12xf32, #tpu.memory_space<vmem>>, %arg1: memref<16x16xf32, #tpu.memory_space<vmem>>, %arg2: memref<12x128xf32, #tpu.memory_space<vmem>>, %arg3: memref<1x128xf32, #tpu.memory_space<vmem>>, %arg4: memref<16x16xf32, #tpu.memory_space<vmem>>, %arg5: memref<16x128xf32, #tpu.memory_space<vmem>>, %arg6: memref<16x128xf32, #tpu.memory_space<vmem>>) attributes {dimension_semantics = [], scalar_prefetch = 0 : i64, scratch_operands = 0 : i64, tpu.core_type = #tpu.core_type<tc>} {
    %c0 = arith.constant 0 : index
    %c0_0 = arith.constant 0 : index
    %0 = vector.load %arg1[%c0, %c0_0] : memref<16x16xf32, #tpu.memory_space<vmem>>, vector<16x16xf32>
    %c0_1 = arith.constant 0 : index
    %c0_2 = arith.constant 0 : index
    %1 = vector.load %arg4[%c0_1, %c0_2] : memref<16x16xf32, #tpu.memory_space<vmem>>, vector<16x16xf32>
    %2 = arith.mulf %0, %1 : vector<16x16xf32>
    %3 = math.absf %2 : vector<16x16xf32>
    %cst = arith.constant dense<0.000000e+00> : vector<16xf32>
    %4 = vector.multi_reduction <add>, %3, %cst [1] : vector<16x16xf32> to vector<16xf32>
    %5 = vector.shape_cast %4 : vector<16xf32> to vector<16x1xf32>
    %cst_3 = arith.constant 9.99999996E-13 : f32
    %6 = vector.broadcast %cst_3 : f32 to vector<16x1xf32>
    %7 = arith.maximumf %5, %6 : vector<16x1xf32>
    %8 = tpu.reciprocal %7 : vector<16x1xf32> -> vector<16x1xf32>
    %9 = vector.broadcast %8 : vector<16x1xf32> to vector<16x16xf32>
    %10 = arith.mulf %2, %9 : vector<16x16xf32>
    %c0_4 = arith.constant 0 : index
    %c0_5 = arith.constant 0 : index
    %11 = vector.load %arg0[%c0_4, %c0_5] : memref<16x12xf32, #tpu.memory_space<vmem>>, vector<16x12xf32>
    %c0_6 = arith.constant 0 : index
    %c0_7 = arith.constant 0 : index
    %12 = vector.load %arg2[%c0_6, %c0_7] : memref<12x128xf32, #tpu.memory_space<vmem>>, vector<12x128xf32>
    %cst_8 = arith.constant dense<0.000000e+00> : vector<16x128xf32>
    %13 = tpu.matmul %11, %12, %cst_8 {dimension_numbers = #tpu.dot_dimension_numbers<[1], [0], [0], [1], [0, 0, 1, 1], [], []>} : vector<16x12xf32>, vector<12x128xf32>, vector<16x128xf32> -> vector<16x128xf32>
    %cst_9 = arith.constant dense<0.000000e+00> : vector<16x128xf32>
    %14 = tpu.matmul %10, %13, %cst_9 {dimension_numbers = #tpu.dot_dimension_numbers<[1], [0], [0], [1], [0, 0, 1, 1], [], []>} : vector<16x16xf32>, vector<16x128xf32>, vector<16x128xf32> -> vector<16x128xf32>
    %c0_10 = arith.constant 0 : index
    %c0_11 = arith.constant 0 : index
    %15 = vector.load %arg3[%c0_10, %c0_11] : memref<1x128xf32, #tpu.memory_space<vmem>>, vector<1x128xf32>
    %16 = vector.broadcast %15 : vector<1x128xf32> to vector<16x128xf32>
    %17 = arith.addf %14, %16 : vector<16x128xf32>
    %c0_12 = arith.constant 0 : index
    %c0_13 = arith.constant 0 : index
    %18 = vector.load %arg5[%c0_12, %c0_13] : memref<16x128xf32, #tpu.memory_space<vmem>>, vector<16x128xf32>
    tpu.vector_store %arg5[%c0_12, %c0_13], %17 {strides = array<i32>} : memref<16x128xf32, #tpu.memory_space<vmem>>, vector<16x128xf32>,
    %cst_14 = arith.constant dense<0.000000e+00> : vector<16x128xf32>
    %19 = tpu.matmul %10, %14, %cst_14 {dimension_numbers = #tpu.dot_dimension_numbers<[1], [0], [0], [1], [0, 0, 1, 1], [], []>} : vector<16x16xf32>, vector<16x128xf32>, vector<16x128xf32> -> vector<16x128xf32>
    %cst_15 = arith.constant dense<0.000000e+00> : vector<16x128xf32>
    %20 = tpu.matmul %10, %19, %cst_15 {dimension_numbers = #tpu.dot_dimension_numbers<[1], [0], [0], [1], [0, 0, 1, 1], [], []>} : vector<16x16xf32>, vector<16x128xf32>, vector<16x128xf32> -> vector<16x128xf32>
    %c0_16 = arith.constant 0 : index
    %c0_17 = arith.constant 0 : index
    %21 = vector.load %arg6[%c0_16, %c0_17] : memref<16x128xf32, #tpu.memory_space<vmem>>, vector<16x128xf32>
    tpu.vector_store %arg6[%c0_16, %c0_17], %20 {strides = array<i32>} : memref<16x128xf32, #tpu.memory_space<vmem>>, vector<16x128xf32>,
    return
  }
}

</mosaic_0001>

<bundles_post_ra>
// kernel: lpa_gcn_layer_forward.1
= control target key start
LH: loop header
LB: loop body
LE: loop exit
PB: predicated region body
PF: predicated region fallthrough
CT: control target
= control target key end

     0   :  { %vm81_vm0 = vcmask 1043456   ;;  %vm74_vm1 = vcmask 97280   ;;  %vm31_vm2 = vcmask 130048   ;;  %s342_s0 = inlined_call_operand.vmem [shape: f32[16,12], index: 0, kind: input, shape index: {}]   ;;  %s343_s1 = inlined_call_operand.vmem [shape: f32[16,16], index: 1, kind: input, shape index: {}]   ;;  %s344_s2 = inlined_call_operand.vmem [shape: f32[12,128], index: 2, kind: input, shape index: {}]   ;;  %s345_s3 = inlined_call_operand.vmem [shape: f32[1,128], index: 3, kind: input, shape index: {}]   ;;  %s346_s4 = inlined_call_operand.vmem [shape: f32[16,16], index: 4, kind: input, shape index: {}]   ;;  %s347_s5 = inlined_call_operand.hbm [shape: f32[16,128], index: 5, kind: output, shape index: {0}]   ;;  %s348_s6 = inlined_call_operand.vmem [shape: f32[16,128], index: 6, kind: output, shape index: {1}]  }
   0x1   :  { %v73_v0 = vld [vmem:[%s344_s2 + $0x8] sm:$0xf]  ;;  %v72_v1 = vld [vmem:[%s344_s2] sm:$0xff] }
   0x2   :  { %215 = vmatpush.msk.msra.mxu0 %vm81_vm0, %v73_v0  ;;  %v70_v2 = vld [vmem:[%s342_s0] sm:$0xff]  ;;  %v24_v6 = vld [vmem:[%s343_s1 + $0x8] sm:$0xff] }
   0x3   :  { %v23_v3 = vld [vmem:[%s343_s1] sm:$0xff]  ;;  %v26_v7 = vld [vmem:[%s346_s4 + $0x8] sm:$0xff] }
   0x4   :  { %v25_v4 = vld [vmem:[%s346_s4] sm:$0xff]  ;;  %100 = vmatpush.msra.mxu0 %v72_v1 }
   0x5   :  { %v27_v5 = vmul.f32 %v25_v4, %v23_v3 }
   0x6   :  { %12 = vsyncpa [#allocation3], 0  ;;  %216 = vmatmul.msk.f32.vlgmr.msra.gmra.mxu0 %vm74_vm1, %v70_v2  ;;  %v28_v9 = vmul.f32 %v26_v7, %v24_v6  ;;  %v71_v12 = vld [vmem:[%s342_s0 + $0x8] sm:$0xff]  ;;  %v227_v42 = vld [vmem:[%s345_s3] ss:$0 sm:$0xff]  ;;  %s258_s3 = smov [#allocation2]  }
   0x7   :  { %v29_v8 = vand.u32 2147483647, %v27_v5  ;;  %s197_s4 = sshll.u32 %s258_s3, 4  ;;  %s199_s14 = sshll.u32 %s347_s5, 4  ;;  %s198_s4 = int_to_ptr.vmem [resolvable:$true] %s197_s4  ;;  %s200_s14 = int_to_ptr.hbm [resolvable:$true] %s199_s14 }
   0x8   :  { %v30_v11 = vand.u32 2147483647, %v28_v9  ;;  %s259_s15 = smov 128   ;;  %s260_s16 = smov 8  }
   0x9   :  { %v32_v10 = vsel %vm31_vm2, %v29_v8, 0.0 }
   0xa   :  { %33 = vadd.xlane.f32.xlu0 %v32_v10  ;;  %v35_v13 = vsel %vm31_vm2, %v30_v11, 0.0 }
   0xe   :  { %217 = vmatmul.msk.f32.gmra.mxu0 %vm74_vm1, %v71_v12 }
  0x12   :  { %36 = vadd.xlane.f32.xlu0 %v35_v13 }
  0x7d   :  { %v34_v14 = vpop.xlane.xlu0 %33 }
  0x7e   :  { %v38_v15 = vmax.f32 %v34_v14, 1e-12 }
  0x80   :  { %228 = vrcp.f32 %v38_v15  ;;  %v51_v22 = vand.u32 2147483648, %v38_v15  ;;  %v49_v24 = vand.u32 2147483647, %v38_v15  ;;  %vm45_vm4 = vweird.f32 %v38_v15 }
  0x82   :  { %v52_v28 = vor.u32 1.1754944e-38, %v51_v22  ;;  %vm50_vm6 = vcmp.eq.f32.partialorder %v49_v24, 8.507059e+37 }
  0x83   :  { %v102_v16 = vpop.f32.mrf.mxu0 }
  0x85   :  { %v37_v17 = vpop.xlane.xlu0 %36 }
  0x86   :  { %v229_v18 = vpop.eup %228  ;;  %v39_v19 = vmax.f32 %v37_v17, 1e-12 }
  0x87   :  { %v41_v20 = vmul.f32 %v229_v18, %v38_v15  ;;  %vm46_vm3 = vweird.f32 %v229_v18 }
  0x88   :  { %230 = vrcp.f32 %v39_v19  ;;  %vm47_vm5 = vmor %vm45_vm4, %vm46_vm3  ;;  %v65_v34 = vand.u32 2147483648, %v39_v19  ;;  %v63_v36 = vand.u32 2147483647, %v39_v19  ;;  %vm59_vm8 = vweird.f32 %v39_v19 }
  0x89   :  { %v42_v21 = vsub.f32 1.0, %v41_v20 }
  0x8a   :  { %v66_v38 = vor.u32 1.1754944e-38, %v65_v34  ;;  %vm64_vm10 = vcmp.eq.f32.partialorder %v63_v36, 8.507059e+37 }
  0x8b   :  { %v43_v23 = vmul.f32 %v229_v18, %v42_v21  ;;  %v105_v25 = vpop.f32.mrf.mxu0 }
  0x8c   :  { %128 = vmatpush.msra.mxu1 %v105_v25 }
  0x8d   :  { %v44_v26 = vadd.f32 %v229_v18, %v43_v23 }
  0x8e   :  { %v231_v27 = vpop.eup %230  ;;  %129 = vmatpush.msra.mxu1 %v102_v16 }
  0x8f   :  { %v55_v29 = vmul.f32 %v231_v27, %v39_v19  ;;  %v48_v30 = vsel %vm47_vm5, %v229_v18, %v44_v26  ;;  %vm60_vm7 = vweird.f32 %v231_v27 }
  0x90   :  { %v53_v31 = vsel %vm50_vm6, %v52_v28, %v48_v30  ;;  %vm61_vm9 = vmor %vm59_vm8, %vm60_vm7 }
  0x91   :  { %v56_v32 = vsub.f32 1.0, %v55_v29  ;;  %v68_v33 = vmul.f32 %v53_v31, %v27_v5 }
  0x93   :  { %218 = vmatmul.msk.f32.vlgmr.msra.gmra.mxu1 %vm31_vm2, %v68_v33  ;;  %v57_v35 = vmul.f32 %v231_v27, %v56_v32 }
  0x95   :  { %v58_v37 = vadd.f32 %v231_v27, %v57_v35 }
  0x97   :  { %v62_v39 = vsel %vm61_vm9, %v231_v27, %v58_v37 }
  0x98   :  { %v67_v40 = vsel %vm64_vm10, %v66_v38, %v62_v39 }
  0x99   :  { %v69_v41 = vmul.f32 %v67_v40, %v28_v9 }
  0x9b   :  { %219 = vmatmul.msk.f32.gmra.mxu1 %vm31_vm2, %v69_v41 }
 0x110   :  { %v131_v43 = vpop.f32.mrf.mxu1 }
 0x111   :  { %v141_v44 = vadd.f32 %v227_v42, %v131_v43 }
 0x113   :  { %143 = vst [vmem:[#allocation2] sm:$0xff] %v141_v44 }
 0x118   :  { %v134_v45 = vpop.f32.mrf.mxu1 }
 0x119   :  { %v142_v46 = vadd.f32 %v227_v42, %v134_v45  ;;  %159 = vmatpush.msra.mxu2 %v134_v45 }
 0x11b   :  { %144 = vst [vmem:[#allocation2 + $0x8] sm:$0xff] %v142_v46  ;;  %160 = vmatpush.msra.mxu2 %v131_v43 }
 0x11c   :  { %220 = vmatmul.msk.f32.vlgmr.msra.gmra.mxu2 %vm31_vm2, %v68_v33  ;;  %205 = dma.vmem_to_hbm [thread:$0]  %s198_s4, 256, %s200_s14, [#allocation3], %s259_s15, %s259_s15, %s260_s16  }
 0x124   :  { %221 = vmatmul.msk.f32.gmra.mxu2 %vm31_vm2, %v69_v41 }
 0x19f   :  { %v162_v47 = vpop.f32.mrf.mxu2 }
 0x1a7   :  { %v165_v48 = vpop.f32.mrf.mxu2 }
 0x1a8   :  { %182 = vmatpush.msra.mxu3 %v165_v48 }
 0x1aa   :  { %183 = vmatpush.msra.mxu3 %v162_v47 }
 0x1ab   :  { %222 = vmatmul.msk.f32.vlgmr.msra.gmra.mxu3 %vm31_vm2, %v68_v33 }
 0x1b3   :  { %223 = vmatmul.msk.f32.gmra.mxu3 %vm31_vm2, %v69_v41 }
 0x22e   :  { %v185_v49 = vpop.f32.mrf.mxu3 }
 0x22f   :  { %191 = vst [vmem:[%s348_s6] sm:$0xff] %v185_v49 }
 0x236   :  { %v188_v50 = vpop.f32.mrf.mxu3 }
 0x237   :  { %192 = vst [vmem:[%s348_s6 + $0x8] sm:$0xff] %v188_v50 }
 0x238   :  { %256 = dma.done.wait [#allocation3], 256  }
 0x239   :  { %257 = vsyncadd [#allocation3], 4294967040 }
 0x23a   :  { %214 = vsyncpa [#allocation3], 1 }

</bundles_post_ra>
